<compile_context>
chip_gen: v6e
topology: v6e:2x2x1
jax: 0.10.0
libtpu: 0.0.40
codegen_flags: <defaults>
</compile_context>

<pallas_src>
import functools

import jax
import jax.numpy as jnp
from jax.experimental import pallas as pl
from jax.experimental.pallas import tpu as pltpu


def _ca_kernel(x_ref, w1t_ref, w2t_ref, o_ref, sum_lanes, max_lanes,
               *, hw_total, hw_tile, needs_mask):
    """One (Nb, C, Thw) tile of x; accumulates lane-wise sum/max over the HW axis.

    x_ref    : (Nb, C, Thw)   native dtype
    w1t_ref  : (C, Cr)        fc1 weight, pre-transposed (in, out), f32
    w2t_ref  : (Cr, C)        fc2 weight, pre-transposed (in, out), f32
    o_ref    : (Nb, C)        written only at the last HW step
    sum_lanes/max_lanes : (Nb, C, 128) f32 VMEM scratch (lane-wise running stats)
    """
    k = pl.program_id(1)
    nk = pl.num_programs(1)

    @pl.when(k == 0)
    def _init():
        sum_lanes[...] = jnp.zeros(sum_lanes.shape, sum_lanes.dtype)
        max_lanes[...] = jnp.full(max_lanes.shape, -jnp.inf, max_lanes.dtype)

    nfull = hw_tile // 128                 # full 128-lane slices per tile
    rem = hw_tile - nfull * 128            # leftover lanes (< 128); only when untiled

    # Group several 128-lane slices per loop iteration: fold them element-wise in
    # vregs first, then do ONE read-modify-write of the VMEM accumulators.
    group = 1
    for cand in (8, 4, 2):
        if nfull >= cand and nfull % cand == 0:
            group = cand
            break
    ngroups = nfull // group if nfull > 0 else 0

    def _accumulate(masked):
        if masked:
            valid = hw_total - k * hw_tile          # valid lanes in this tile

        def load_slice(off, width):
            v = x_ref[:, :, pl.ds(off, width)].astype(jnp.float32)
            if masked:
                lane = jax.lax.broadcasted_iota(jnp.int32, v.shape, 2) + off
                keep = lane < valid
                return jnp.where(keep, v, 0.0), jnp.where(keep, v, -jnp.inf)
            return v, v

        if nfull > 0:
            def group_body(g, carry):
                base = pl.multiple_of(g * (group * 128), 128)
                s, m = load_slice(base, 128)
                for t in range(1, group):
                    s2, m2 = load_slice(base + t * 128, 128)
                    s = s + s2
                    m = jnp.maximum(m, m2)
                sum_lanes[...] = sum_lanes[...] + s
                max_lanes[...] = jnp.maximum(max_lanes[...], m)
                return carry

            jax.lax.fori_loop(0, ngroups, group_body, 0,
                              unroll=(ngroups <= 8))

        if rem > 0:
            # Only reachable when HW is untiled (hw_tile == HW), hence never masked.
            s, m = load_slice(nfull * 128, rem)                 # (Nb, C, rem)
            sum_lanes[:, :, :rem] = sum_lanes[:, :, :rem] + s
            max_lanes[:, :, :rem] = jnp.maximum(max_lanes[:, :, :rem], m)

    if needs_mask:
        # Mask only where it is needed: the final (overhanging) HW tile.
        @pl.when(k == nk - 1)
        def _masked_step():
            _accumulate(masked=True)

        @pl.when(k != nk - 1)
        def _plain_step():
            _accumulate(masked=False)
    else:
        _accumulate(masked=False)

    @pl.when(k == nk - 1)
    def _finalize():
        nb = sum_lanes.shape[0]
        # Single deferred cross-lane (XLU) reduce per batch tile.
        avg = jnp.sum(sum_lanes[...], axis=-1) * (1.0 / float(hw_total))   # (Nb, C)
        mx = jnp.max(max_lanes[...], axis=-1)                              # (Nb, C)
        # Fuse avg/max branches into one MXU pass: (2*Nb, C) LHS.
        p = jnp.concatenate([avg, mx], axis=0)                             # (2Nb, C)
        h = jnp.dot(p, w1t_ref[...], preferred_element_type=jnp.float32)   # (2Nb, Cr)
        h = jnp.maximum(h, 0.0)                                            # ReLU
        y = jnp.dot(h, w2t_ref[...], preferred_element_type=jnp.float32)   # (2Nb, C)
        logits = y[:nb, :] + y[nb:, :]
        o_ref[...] = jax.nn.sigmoid(logits).astype(o_ref.dtype)


def _default_budget():
    """Generation-aware (max_block_bytes, vmem_limit_bytes)."""
    vmem_cap = None
    try:
        info = pltpu.get_tpu_info()
        vmem_cap = getattr(info, "vmem_capacity_bytes", None)
    except Exception:
        vmem_cap = None
    if vmem_cap is not None and vmem_cap >= (100 << 20):
        # v5e / v6e: 128 MiB physical VMEM -> bigger blocks, raised scoped limit.
        return 8 << 20, 64 << 20
    # v7x (64 MiB physical VMEM) or unknown: stay conservative.
    return 4 << 20, 32 << 20


def _pick_tiles(N, C, HW, itemsize, max_block_bytes):
    # Batch tile: 8 rows whenever N > 8 so the "parallel" axis has >=2 blocks
    # (keeps the second v7x TensorCore busy) and the (Nb, C) output block obeys
    # the sublane rule; otherwise take the full batch.
    Nb = 8 if N > 8 else N
    # Spatial tile: largest tile under the per-block budget (double-buffered by
    # the pipeline). When tiling is forced, floor Thw so per-row DMA runs >= ~2 KB.
    max_thw = max(1, max_block_bytes // (Nb * C * itemsize))
    if HW <= max_thw:
        return Nb, HW                                  # no HW tiling
    floor_thw = 512 if itemsize >= 4 else 1024
    Thw = max(floor_thw, (max_thw // 512) * 512)       # multiple of 512 lanes
    if Thw >= HW:
        return Nb, HW
    return Nb, Thw


def channel_attention(x, w1_conv, w2_conv, *, max_block_bytes=None,
                      vmem_limit_bytes=None):
    """x: (N, C, H, W) NCHW (any float dtype). w1_conv: (Cr, C, 1, 1). w2_conv: (C, Cr, 1, 1)."""
    N, C, H, W = x.shape
    Cr = w1_conv.shape[0]
    HW = H * W

    db_block, db_limit = _default_budget()
    if max_block_bytes is None:
        max_block_bytes = db_block
    if vmem_limit_bytes is None:
        vmem_limit_bytes = db_limit

    # Stream x in its native dtype; only the tiny weights are cast/transposed on host.
    x3 = x.reshape(N, C, HW)
    w1t = w1_conv.reshape(Cr, C).astype(jnp.float32).T       # (C, Cr)
    w2t = w2_conv.reshape(C, Cr).astype(jnp.float32).T       # (Cr, C)

    Nb, Thw = _pick_tiles(N, C, HW, x3.dtype.itemsize, max_block_bytes)
    n_tiles = pl.cdiv(N, Nb)
    k_tiles = pl.cdiv(HW, Thw)
    needs_mask = (HW % Thw) != 0

    # TODO(synk): for N <= 8 on v7x the single "parallel" batch block leaves one
    # TensorCore idle; splitting the HW reduction across cores would need a
    # two-pass (partial stats + combine) structure not implemented here.

    kernel = functools.partial(_ca_kernel, hw_total=HW, hw_tile=Thw,
                               needs_mask=needs_mask)

    cost = pl.CostEstimate(
        flops=2 * N * C * HW + 2 * (2 * N) * C * Cr * 2,
        transcendentals=N * C,
        bytes_accessed=N * C * HW * x3.dtype.itemsize
        + 2 * C * Cr * 4 + N * C * x.dtype.itemsize,
    )

    out = pl.pallas_call(
        kernel,
        out_shape=jax.ShapeDtypeStruct((N, C), x.dtype),
        grid_spec=pltpu.PrefetchScalarGridSpec(
            num_scalar_prefetch=0,
            grid=(n_tiles, k_tiles),
            in_specs=[
                pl.BlockSpec((Nb, C, Thw), lambda i, k: (i, 0, k)),
                pl.BlockSpec((C, Cr), lambda i, k: (0, 0)),
                pl.BlockSpec((Cr, C), lambda i, k: (0, 0)),
            ],
            out_specs=pl.BlockSpec((Nb, C), lambda i, k: (i, 0)),
            scratch_shapes=[
                pltpu.VMEM((Nb, C, 128), jnp.float32),   # lane-wise running sum
                pltpu.VMEM((Nb, C, 128), jnp.float32),   # lane-wise running max
            ],
        ),
        compiler_params=pltpu.CompilerParams(
            dimension_semantics=("parallel", "arbitrary"),
            vmem_limit_bytes=vmem_limit_bytes,
        ),
        cost_estimate=cost,
    )(x3, w1t, w2t)

    # Back to NCHW (N, C, 1, 1), matching the PyTorch module's output shape.
    return out.reshape(N, C, 1, 1)


def channel_attention_ref(x, w1_conv, w2_conv):
    """Pure-JAX reference mirroring the PyTorch forward."""
    N, C, H, W = x.shape
    Cr = w1_conv.shape[0]
    w1 = w1_conv.reshape(Cr, C).astype(jnp.float32)
    w2 = w2_conv.reshape(C, Cr).astype(jnp.float32)
    xf = x.astype(jnp.float32)
    avg = xf.mean(axis=(2, 3))        # (N, C)
    mx = xf.max(axis=(2, 3))          # (N, C)

    def mlp(p):
        return jnp.maximum(p @ w1.T, 0.0) @ w2.T

    out = jax.nn.sigmoid(mlp(avg) + mlp(mx))
    return out.reshape(N, C, 1, 1).astype(x.dtype)


def _run_case(key, N, C, H, W, reduction, dtype=jnp.float32, atol=1e-5, **kw):
    Cr = max(1, C // reduction)
    kx, k1, k2 = jax.random.split(key, 3)
    x = jax.random.normal(kx, (N, C, H, W), dtype=jnp.float32).astype(dtype)
    w1_conv = jax.random.normal(k1, (Cr, C, 1, 1), dtype=jnp.float32) * 0.1
    w2_conv = jax.random.normal(k2, (C, Cr, 1, 1), dtype=jnp.float32) * 0.1

    out = jax.block_until_ready(channel_attention(x, w1_conv, w2_conv, **kw))
    ref = channel_attention_ref(x, w1_conv, w2_conv)
    assert out.shape == (N, C, 1, 1)
    assert jnp.allclose(out.astype(jnp.float32), ref.astype(jnp.float32),
                        atol=atol, rtol=1e-4), f"mismatch N={N} C={C} H={H} W={W}"


if __name__ == "__main__":
    key = jax.random.PRNGKey(0)
    k0, k1, k2, k3, k4 = jax.random.split(key, 5)

    # Main case (matches original test shape): C=64, r=16 -> Cr=4, HW=256 (untiled).
    _run_case(k0, N=2, C=64, H=16, W=16, reduction=16)

    # Odd spatial / odd batch: exercises the sub-128 remainder-lane path.
    _run_case(k1, N=3, C=32, H=7, W=9, reduction=8)

    # Force HW tiling + last-step masking (HW=784, Thw=512 -> 2 tiles, last masked).
    _run_case(k2, N=2, C=8, H=28, W=28, reduction=2, max_block_bytes=4096)

    # Batch overhang: N=12, Nb=8 -> 2 "parallel" batch tiles, second one overhangs.
    _run_case(k3, N=12, C=32, H=8, W=8, reduction=8)

    # bf16 streaming input (f32 accumulation inside the kernel).
    _run_case(k4, N=2, C=16, H=12, W=12, reduction=4, dtype=jnp.bfloat16, atol=1e-2)

    print("KERNEL_OK")
</pallas_src>

<mosaic_0001>
module attributes {stable_mosaic.version = 11 : i64} {
  func.func @_ca_kernel(%arg0: i32, %arg1: i32, %arg2: memref<2x64x256xf32, #tpu.memory_space<vmem>>, %arg3: memref<64x4xf32, #tpu.memory_space<vmem>>, %arg4: memref<4x64xf32, #tpu.memory_space<vmem>>, %arg5: memref<2x64xf32, #tpu.memory_space<vmem>>, %arg6: memref<2x64x128xf32, #tpu.memory_space<vmem>>, %arg7: memref<2x64x128xf32, #tpu.memory_space<vmem>>) attributes {dimension_semantics = [#tpu.dimension_semantics<parallel>, #tpu.dimension_semantics<arbitrary>], iteration_bounds = array<i64: 1, 1>, scalar_prefetch = 0 : i64, scratch_operands = 2 : i64, tpu.core_type = #tpu.core_type<tc>, window_params = [{transform_indices = @transform_0, window_bounds = array<i64: 2, 64, 256>}, {pipeline_mode = #tpu.pipeline_mode<synchronous>, transform_indices = @transform_1, window_bounds = array<i64: 64, 4>}, {pipeline_mode = #tpu.pipeline_mode<synchronous>, transform_indices = @transform_2, window_bounds = array<i64: 4, 64>}, {transform_indices = @transform_3, window_bounds = array<i64: 2, 64>}]} {
    %c0_i32 = arith.constant 0 : i32
    %0 = arith.cmpi eq, %arg1, %c0_i32 : i32
    %1 = arith.extui %0 : i1 to i32
    %c0_i32_0 = arith.constant 0 : i32
    %2 = arith.cmpi ne, %1, %c0_i32_0 : i32
    scf.if %2 {
      %cst = arith.constant 0.000000e+00 : f32
      %21 = vector.broadcast %cst : f32 to vector<2x64x128xf32>
      %c0_19 = arith.constant 0 : index
      %c0_20 = arith.constant 0 : index
      %c0_21 = arith.constant 0 : index
      %22 = vector.load %arg6[%c0_19, %c0_20, %c0_21] : memref<2x64x128xf32, #tpu.memory_space<vmem>>, vector<2x64x128xf32>
      tpu.vector_store %arg6[%c0_19, %c0_20, %c0_21], %21 {strides = array<i32>} : memref<2x64x128xf32, #tpu.memory_space<vmem>>, vector<2x64x128xf32>,
      %cst_22 = arith.constant 0xFF800000 : f32
      %23 = vector.broadcast %cst_22 : f32 to vector<2x64x128xf32>
      %c0_23 = arith.constant 0 : index
      %c0_24 = arith.constant 0 : index
      %c0_25 = arith.constant 0 : index
      %24 = vector.load %arg7[%c0_23, %c0_24, %c0_25] : memref<2x64x128xf32, #tpu.memory_space<vmem>>, vector<2x64x128xf32>
      tpu.vector_store %arg7[%c0_23, %c0_24, %c0_25], %23 {strides = array<i32>} : memref<2x64x128xf32, #tpu.memory_space<vmem>>, vector<2x64x128xf32>,
    } else {
    }
    %c0_i32_1 = arith.constant 0 : i32
    %c256_i32 = arith.constant 256 : i32
    %3 = arith.muli %c0_i32_1, %c256_i32 : i32
    %4 = tpu.assume_multiple %3, 128 : i32
    %c0 = arith.constant 0 : index
    %c0_2 = arith.constant 0 : index
    %5 = arith.index_cast %4 : i32 to index
    %6 = vector.load %arg2[%c0, %c0_2, %5] : memref<2x64x256xf32, #tpu.memory_space<vmem>>, vector<2x64x128xf32>
    %c128_i32 = arith.constant 128 : i32
    %7 = arith.addi %4, %c128_i32 : i32
    %c0_3 = arith.constant 0 : index
    %c0_4 = arith.constant 0 : index
    %8 = arith.index_cast %7 : i32 to index
    %9 = vector.load %arg2[%c0_3, %c0_4, %8] : memref<2x64x256xf32, #tpu.memory_space<vmem>>, vector<2x64x128xf32>
    %10 = arith.addf %6, %9 : vector<2x64x128xf32>
    %11 = arith.maximumf %6, %9 : vector<2x64x128xf32>
    %c0_5 = arith.constant 0 : index
    %c0_6 = arith.constant 0 : index
    %c0_7 = arith.constant 0 : index
    %12 = vector.load %arg6[%c0_5, %c0_6, %c0_7] : memref<2x64x128xf32, #tpu.memory_space<vmem>>, vector<2x64x128xf32>
    %13 = arith.addf %12, %10 : vector<2x64x128xf32>
    %c0_8 = arith.constant 0 : index
    %c0_9 = arith.constant 0 : index
    %c0_10 = arith.constant 0 : index
    %14 = vector.load %arg6[%c0_8, %c0_9, %c0_10] : memref<2x64x128xf32, #tpu.memory_space<vmem>>, vector<2x64x128xf32>
    tpu.vector_store %arg6[%c0_8, %c0_9, %c0_10], %13 {strides = array<i32>} : memref<2x64x128xf32, #tpu.memory_space<vmem>>, vector<2x64x128xf32>,
    %c0_11 = arith.constant 0 : index
    %c0_12 = arith.constant 0 : index
    %c0_13 = arith.constant 0 : index
    %15 = vector.load %arg7[%c0_11, %c0_12, %c0_13] : memref<2x64x128xf32, #tpu.memory_space<vmem>>, vector<2x64x128xf32>
    %16 = arith.maximumf %15, %11 : vector<2x64x128xf32>
    %c0_14 = arith.constant 0 : index
    %c0_15 = arith.constant 0 : index
    %c0_16 = arith.constant 0 : index
    %17 = vector.load %arg7[%c0_14, %c0_15, %c0_16] : memref<2x64x128xf32, #tpu.memory_space<vmem>>, vector<2x64x128xf32>
    tpu.vector_store %arg7[%c0_14, %c0_15, %c0_16], %16 {strides = array<i32>} : memref<2x64x128xf32, #tpu.memory_space<vmem>>, vector<2x64x128xf32>,
    %c1_i32 = arith.constant 1 : i32
    %c0_i32_17 = arith.constant 0 : i32
    %18 = arith.cmpi eq, %arg1, %c0_i32_17 : i32
    %19 = arith.extui %18 : i1 to i32
    %c0_i32_18 = arith.constant 0 : i32
    %20 = arith.cmpi ne, %19, %c0_i32_18 : i32
    scf.if %20 {
      %c0_19 = arith.constant 0 : index
      %c0_20 = arith.constant 0 : index
      %c0_21 = arith.constant 0 : index
      %21 = vector.load %arg6[%c0_19, %c0_20, %c0_21] : memref<2x64x128xf32, #tpu.memory_space<vmem>>, vector<2x64x128xf32>
      %cst = arith.constant dense<0.000000e+00> : vector<2x64xf32>
      %22 = vector.multi_reduction <add>, %21, %cst [2] : vector<2x64x128xf32> to vector<2x64xf32>
      %cst_22 = arith.constant 3.906250e-03 : f32
      %23 = vector.broadcast %cst_22 : f32 to vector<2x64xf32>
      %24 = arith.mulf %22, %23 : vector<2x64xf32>
      %c0_23 = arith.constant 0 : index
      %c0_24 = arith.constant 0 : index
      %c0_25 = arith.constant 0 : index
      %25 = vector.load %arg7[%c0_23, %c0_24, %c0_25] : memref<2x64x128xf32, #tpu.memory_space<vmem>>, vector<2x64x128xf32>
      %cst_26 = arith.constant dense<0xFF800000> : vector<2x64xf32>
      %26 = vector.multi_reduction <maximumf>, %25, %cst_26 [2] : vector<2x64x128xf32> to vector<2x64xf32>
      %27 = tpu.concatenate %24, %26 in 0 : vector<2x64xf32>, vector<2x64xf32> -> vector<4x64xf32>
      %c0_27 = arith.constant 0 : index
      %c0_28 = arith.constant 0 : index
      %28 = vector.load %arg3[%c0_27, %c0_28] : memref<64x4xf32, #tpu.memory_space<vmem>>, vector<64x4xf32>
      %cst_29 = arith.constant dense<0.000000e+00> : vector<4x4xf32>
      %29 = tpu.matmul %27, %28, %cst_29 {dimension_numbers = #tpu.dot_dimension_numbers<[1], [0], [0], [1], [0, 0, 1, 1], [], []>} : vector<4x64xf32>, vector<64x4xf32>, vector<4x4xf32> -> vector<4x4xf32>
      %cst_30 = arith.constant 0.000000e+00 : f32
      %30 = vector.broadcast %cst_30 : f32 to vector<4x4xf32>
      %31 = arith.maximumf %29, %30 : vector<4x4xf32>
      %c0_31 = arith.constant 0 : index
      %c0_32 = arith.constant 0 : index
      %32 = vector.load %arg4[%c0_31, %c0_32] : memref<4x64xf32, #tpu.memory_space<vmem>>, vector<4x64xf32>
      %cst_33 = arith.constant dense<0.000000e+00> : vector<4x64xf32>
      %33 = tpu.matmul %31, %32, %cst_33 {dimension_numbers = #tpu.dot_dimension_numbers<[1], [0], [0], [1], [0, 0, 1, 1], [], []>} : vector<4x4xf32>, vector<4x64xf32>, vector<4x64xf32> -> vector<4x64xf32>
      %34 = vector.extract_strided_slice %33 {offsets = [0, 0], sizes = [2, 64], strides = [1, 1]} : vector<4x64xf32> to vector<2x64xf32>
      %35 = vector.extract_strided_slice %33 {offsets = [2, 0], sizes = [2, 64], strides = [1, 1]} : vector<4x64xf32> to vector<2x64xf32>
      %36 = arith.addf %34, %35 : vector<2x64xf32>
      %37 = arith.negf %36 : vector<2x64xf32>
      %38 = math.exp %37 : vector<2x64xf32>
      %cst_34 = arith.constant 1.000000e+00 : f32
      %39 = vector.broadcast %cst_34 : f32 to vector<2x64xf32>
      %40 = arith.addf %39, %38 : vector<2x64xf32>
      %41 = arith.divf %39, %40 : vector<2x64xf32>
      %c0_35 = arith.constant 0 : index
      %c0_36 = arith.constant 0 : index
      %42 = vector.load %arg5[%c0_35, %c0_36] : memref<2x64xf32, #tpu.memory_space<vmem>>, vector<2x64xf32>
      tpu.vector_store %arg5[%c0_35, %c0_36], %41 {strides = array<i32>} : memref<2x64xf32, #tpu.memory_space<vmem>>, vector<2x64xf32>,
    } else {
    }
    return
  }
  func.func @transform_0(%arg0: i32, %arg1: i32) -> (i32, i32, i32) {
    %c0_i32 = arith.constant 0 : i32
    %c0_i32_0 = arith.constant 0 : i32
    return %arg0, %c0_i32, %arg1 : i32, i32, i32
  }
  func.func @transform_1(%arg0: i32, %arg1: i32) -> (i32, i32) {
    %c0_i32 = arith.constant 0 : i32
    %c0_i32_0 = arith.constant 0 : i32
    %c0_i32_1 = arith.constant 0 : i32
    return %c0_i32, %c0_i32_0 : i32, i32
  }
  func.func @transform_2(%arg0: i32, %arg1: i32) -> (i32, i32) {
    %c0_i32 = arith.constant 0 : i32
    %c0_i32_0 = arith.constant 0 : i32
    %c0_i32_1 = arith.constant 0 : i32
    return %c0_i32, %c0_i32_0 : i32, i32
  }
  func.func @transform_3(%arg0: i32, %arg1: i32) -> (i32, i32) {
    %c0_i32 = arith.constant 0 : i32
    %c0_i32_0 = arith.constant 0 : i32
    return %arg0, %c0_i32 : i32, i32
  }
}

</mosaic_0001>

<bundles_post_ra>
// kernel: tpu_custom_call.1
= control target key start
LH: loop header
LB: loop body
LE: loop exit
PB: predicated region body
PF: predicated region fallthrough
CT: control target
= control target key end

     0   :  { %8 = vsyncpa [#allocation5], 0  ;;  %s1008_s0 = inlined_call_operand.hbm [shape: f32[2,64,256], index: 0, kind: input, shape index: {}]   ;;  %s1009_s1 = inlined_call_operand.vmem [shape: f32[64,4], index: 1, kind: input, shape index: {}]   ;;  %s1010_s2 = inlined_call_operand.vmem [shape: f32[4,64], index: 2, kind: input, shape index: {}]   ;;  %s1011_s3 = inlined_call_operand.hbm [shape: f32[2,64], index: 3, kind: output, shape index: {}]  }
   0x1   :  { %9 = vsyncpa [#allocation6], 0  ;;  %s841_s12 = smov [#allocation4]  }
   0x2   :  { %s15_s13 = sshll.u32 %s841_s12, 4  ;;  %s16_s13 = int_to_ptr.vmem [resolvable:$true] %s15_s13 }
   0x3   :  { %s805_s14 = scalar_lea.vmem %s16_s13, 4096  ;;  %p810_p1 = scmp.lt.s32.totalorder %s16_s13, %s16_s13 }
   0x4   :  { %p806_p0 = scmp.ne.s32.totalorder %s16_s13, %s805_s14  ;;  %p811_p2 = scmp.lt.s32.totalorder %s805_s14, %s805_s14 }
   0x6   :  { %p812_p3 = por %p811_p2, %p810_p1 }
   0x8   :  { %p813_p4 = pnand %p812_p3, %p806_p0 }
   0xa   :  { %816 = shalt.err (!%p813_p4)
}
   0xb   :  { %s842_s15 = smov 256   ;;  %s843_s16 = smov 16  }
   0xc   :  { %21 = dma.hbm_to_vmem [thread:$0]  %s1008_s0, 4096, %s16_s13, [#allocation5], %s842_s15, %s842_s15, %s843_s16  }
   0xd   :  { %837 = dma.done.wait [#allocation5], 4096  }
   0xe   :  { %838 = vsyncadd [#allocation5], 4294963200  ;;  %v73_v0 = vld [vmem:[#allocation4 + $0x80] sm:$0xff]  ;;  %v94_v1 = vld [vmem:[#allocation4 + $0x88] sm:$0xff]  ;;  %vm845_vm0 = vmmov 0   ;;  %vm372_vm1 = vcmask 130112  }
   0xf   :  { %v65_v2 = vld [vmem:[#allocation4] sm:$0xff]  ;;  %v110_v3 = vadd.f32 %v94_v1, %v73_v0  ;;  %v86_v4 = vld [vmem:[#allocation4 + $0x8] sm:$0xff]  ;;  %v74_v5 = vld [vmem:[#allocation4 + $0x90] sm:$0xff]  ;;  %v126_v27 = vmax.f32 %v73_v0, %v94_v1  ;;  %v844_v0 = vmov 0.0   ;;  %vm379_vm2 = vcmask 195712   ;;  %s846_s8 = smov [#allocation7]  }
  0x10   :  { %v95_v6 = vld [vmem:[#allocation4 + $0x98] sm:$0xff]  ;;  %v102_v7 = vadd.f32 %v86_v4, %v65_v2  ;;  %v66_v8 = vld [vmem:[#allocation4 + $0x10] sm:$0xff]  ;;  %v75_v12 = vld [vmem:[#allocation4 + $0xa0] sm:$0xff]  ;;  %v118_v25 = vmax.f32 %v65_v2, %v86_v4  ;;  %763 = vmatprep.subr.mxu0 %v844_v0  ;;  %782 = vmatprep.subr.mxu1 %v844_v0  ;;  %vm386_vm3 = vcmask 261312   ;;  %vm393_vm4 = vcmask 326912   ;;  %s737_s9 = sshll.u32 %s846_s8, 4  ;;  %s738_s9 = int_to_ptr.vmem [resolvable:$true] %s737_s9 }
  0x11   :  { %v87_v9 = vld [vmem:[#allocation4 + $0x18] sm:$0xff]  ;;  %265 = vadd.xlane.f32.xlu1 %v110_v3  ;;  %v111_v10 = vadd.f32 %v95_v6, %v74_v5  ;;  %v96_v13 = vld [vmem:[#allocation4 + $0xa8] sm:$0xff]  ;;  %v67_v14 = vld [vmem:[#allocation4 + $0x20] sm:$0xff]  ;;  %v127_v26 = vmax.f32 %v74_v5, %v95_v6  ;;  %779 = vmatprep.mubr.msk.f32.mxu0 %vm845_vm0, %v844_v0  ;;  %vm400_vm5 = vcmask 392512   ;;  %vm407_vm6 = vcmask 458112   ;;  %p822_p6 = scmp.lt.s32.totalorder %s738_s9, %s738_s9 }
  0x12   :  { %249 = vadd.xlane.f32.xlu0 %v102_v7  ;;  %v103_v11 = vadd.f32 %v87_v9, %v66_v8  ;;  %v88_v15 = vld [vmem:[#allocation4 + $0x28] sm:$0xff]  ;;  %v112_v16 = vadd.f32 %v96_v13, %v75_v12  ;;  %v76_v18 = vld [vmem:[#allocation4 + $0xb0] sm:$0xff]  ;;  %v97_v19 = vld [vmem:[#allocation4 + $0xb8] sm:$0xff]  ;;  %v119_v24 = vmax.f32 %v66_v8, %v87_v9  ;;  %v128_v34 = vmax.f32 %v75_v12, %v96_v13 }
  0x13   :  { %v104_v17 = vadd.f32 %v88_v15, %v67_v14  ;;  %v68_v20 = vld [vmem:[#allocation4 + $0x30] sm:$0xff]  ;;  %v89_v21 = vld [vmem:[#allocation4 + $0x38] sm:$0xff]  ;;  %v113_v22 = vadd.f32 %v97_v19, %v76_v18  ;;  %v77_v28 = vld [vmem:[#allocation4 + $0xc0] sm:$0xff]  ;;  %v120_v35 = vmax.f32 %v67_v14, %v88_v15  ;;  %v129_v42 = vmax.f32 %v76_v18, %v97_v19  ;;  %784 = vmatprep.mubr.msk.f32.mxu1 %vm845_vm0, %v844_v0 }
  0x14   :  { %v105_v23 = vadd.f32 %v89_v21, %v68_v20  ;;  %v98_v29 = vld [vmem:[#allocation4 + $0xc8] sm:$0xff]  ;;  %v69_v30 = vld [vmem:[#allocation4 + $0x40] sm:$0xff]  ;;  %v78_v36 = vld [vmem:[#allocation4 + $0xd0] sm:$0xff]  ;;  %v121_v43 = vmax.f32 %v68_v20, %v89_v21  ;;  %vm414_vm7 = vcmask 523712   ;;  %vm455_vm8 = vcmask 1041409  }
  0x15   :  { %267 = vadd.xlane.f32.xlu1 %v111_v10  ;;  %v90_v31 = vld [vmem:[#allocation4 + $0x48] sm:$0xff]  ;;  %v114_v32 = vadd.f32 %v98_v29, %v77_v28  ;;  %v99_v37 = vld [vmem:[#allocation4 + $0xd8] sm:$0xff]  ;;  %v70_v38 = vld [vmem:[#allocation4 + $0x50] sm:$0xff]  ;;  %v130_v50 = vmax.f32 %v77_v28, %v98_v29  ;;  %vm552_vm9 = vcmask 1043459   ;;  %vm555_vm10 = vcmask 1041408  }
  0x16   :  { %251 = vadd.xlane.f32.xlu0 %v103_v11  ;;  %v106_v33 = vadd.f32 %v90_v31, %v69_v30  ;;  %v91_v39 = vld [vmem:[#allocation4 + $0x58] sm:$0xff]  ;;  %v115_v40 = vadd.f32 %v99_v37, %v78_v36  ;;  %v79_v44 = vld [vmem:[#allocation4 + $0xe0] sm:$0xff]  ;;  %v100_v45 = vld [vmem:[#allocation4 + $0xe8] sm:$0xff]  ;;  %v122_v51 = vmax.f32 %v69_v30, %v90_v31  ;;  %v131_v58 = vmax.f32 %v78_v36, %v99_v37 }
  0x17   :  { %v107_v41 = vadd.f32 %v91_v39, %v70_v38  ;;  %v71_v46 = vld [vmem:[#allocation4 + $0x60] sm:$0xff]  ;;  %v92_v47 = vld [vmem:[#allocation4 + $0x68] sm:$0xff]  ;;  %v116_v48 = vadd.f32 %v100_v45, %v79_v44  ;;  %v80_v52 = vld [vmem:[#allocation4 + $0xf0] sm:$0xff]  ;;  %v123_v59 = vmax.f32 %v70_v38, %v91_v39  ;;  %v132_v60 = vmax.f32 %v79_v44, %v100_v45 }
  0x18   :  { %v108_v49 = vadd.f32 %v92_v47, %v71_v46  ;;  %v101_v53 = vld [vmem:[#allocation4 + $0xf8] sm:$0xff]  ;;  %v72_v54 = vld [vmem:[#allocation4 + $0x70] sm:$0xff]  ;;  %v124_v61 = vmax.f32 %v71_v46, %v92_v47  ;;  %v562_v3 = vld [vmem:[%s1009_s1 + $0x28] sm:$0xff]  ;;  %vm565_vm11 = vcmask 523264   ;;  %vm645_vm12 = vcmask 1043456  }
  0x19   :  { %269 = vadd.xlane.f32.xlu1 %v112_v16  ;;  %v93_v55 = vld [vmem:[#allocation4 + $0x78] sm:$0xff]  ;;  %v117_v56 = vadd.f32 %v101_v53, %v80_v52  ;;  %v133_v62 = vmax.f32 %v80_v52, %v101_v53  ;;  %v563_v2 = vld [vmem:[%s1009_s1 + $0x30] sm:$0xff]  ;;  %v561_v4 = vld [vmem:[%s1009_s1 + $0x20] sm:$0xff]  ;;  %vm641_vm13 = vcmask 31744   ;;  %vm729_vm14 = vcmask 517120  }
  0x1a   :  { %253 = vadd.xlane.f32.xlu0 %v104_v17  ;;  %v109_v57 = vadd.f32 %v93_v55, %v72_v54  ;;  %v125_v63 = vmax.f32 %v72_v54, %v93_v55  ;;  %v564_v1 = vld [vmem:[%s1009_s1 + $0x38] sm:$0xff]  ;;  %v559_v6 = vld [vmem:[%s1009_s1 + $0x10] sm:$0xff]  ;;  %v558_v7 = vld [vmem:[%s1009_s1 + $0x8] sm:$0xff] }
  0x1b   :  { %764 = vmatpush3.msra.mxu0 %v564_v1  ;;  %v560_v5 = vld [vmem:[%s1009_s1 + $0x18] sm:$0xff]  ;;  %v557_v8 = vld [vmem:[%s1009_s1] sm:$0xff] }
  0x1c   :  { %765 = vmatprep.subr.mxu0 %v844_v0 }
  0x1d   :  { %271 = vadd.xlane.f32.xlu1 %v113_v22  ;;  %766 = vmatpush3.msra.mxu0 %v563_v2 }
  0x1e   :  { %255 = vadd.xlane.f32.xlu0 %v105_v23  ;;  %767 = vmatprep.subr.mxu0 %v844_v0 }
  0x1f   :  { %768 = vmatpush3.msra.mxu0 %v562_v3 }
  0x20   :  { %769 = vmatprep.subr.mxu0 %v844_v0 }
  0x21   :  { %315 = vmax.xlane.f32.xlu1 %v119_v24  ;;  %770 = vmatpush3.msra.mxu0 %v561_v4 }
  0x22   :  { %313 = vmax.xlane.f32.xlu0 %v118_v25  ;;  %771 = vmatprep.subr.mxu0 %v844_v0  ;;  %v361_v25 = vlaneseq }
  0x23   :  { %772 = vmatpush3.msra.mxu0 %v560_v5 }
  0x24   :  { %773 = vmatprep.subr.mxu0 %v844_v0  ;;  %v362_v28 = vand.u32 127, %v361_v25  ;;  %v364_v29 = vshrl.u32 %v361_v25, 7 }
  0x25   :  { %331 = vmax.xlane.f32.xlu1 %v127_v26  ;;  %774 = vmatpush3.msra.mxu0 %v559_v6 }
  0x26   :  { %329 = vmax.xlane.f32.xlu0 %v126_v27  ;;  %775 = vmatprep.subr.mxu0 %v844_v0  ;;  %v367_v31 = vadd.s32 4294967288, %v362_v28  ;;  %v402_v47 = vadd.s32 4294967248, %v362_v28  ;;  %v409_v52 = vadd.s32 4294967240, %v362_v28 }
  0x27   :  { %776 = vmatpush3.msra.mxu0 %v558_v7 }
  0x28   :  { %777 = vmatprep.subr.mxu0 %v844_v0  ;;  %v912_v37 = vsub.s32 %v367_v31, %v364_v29  ;;  %v935_v3 = vsub.s32 %v409_v52, %v364_v29 }
  0x29   :  { %273 = vadd.xlane.f32.xlu1 %v114_v32  ;;  %778 = vmatpush3.msra.mxu0 %v557_v8  ;;  %v374_v32 = vadd.s32 4294967280, %v362_v28 }
  0x2a   :  { %257 = vadd.xlane.f32.xlu0 %v106_v33 }
  0x2b   :  { %v914_v39 = vsub.s32 %v374_v32, %v364_v29 }
  0x2d   :  { %333 = vmax.xlane.f32.xlu1 %v128_v34  ;;  %v381_v34 = vadd.s32 4294967272, %v362_v28 }
  0x2e   :  { %317 = vmax.xlane.f32.xlu0 %v120_v35  ;;  %v910_v35 = vsub.s32 %v362_v28, %v364_v29 }
  0x2f   :  { %v916_v46 = vsub.s32 %v381_v34, %v364_v29 }
  0x31   :  { %275 = vadd.xlane.f32.xlu1 %v115_v40 }
  0x32   :  { %259 = vadd.xlane.f32.xlu0 %v107_v41 }
  0x35   :  { %335 = vmax.xlane.f32.xlu1 %v129_v42  ;;  %v388_v42 = vadd.s32 4294967264, %v362_v28 }
  0x36   :  { %319 = vmax.xlane.f32.xlu0 %v121_v43  ;;  %v395_v43 = vadd.s32 4294967256, %v362_v28 }
  0x39   :  { %277 = vadd.xlane.f32.xlu1 %v116_v48 }
  0x3a   :  { %261 = vadd.xlane.f32.xlu0 %v108_v49 }
  0x3d   :  { %337 = vmax.xlane.f32.xlu1 %v130_v50 }
  0x3e   :  { %321 = vmax.xlane.f32.xlu0 %v122_v51 }
  0x41   :  { %279 = vadd.xlane.f32.xlu1 %v117_v56 }
  0x42   :  { %263 = vadd.xlane.f32.xlu0 %v109_v57  ;;  %v924_v57 = vsub.s32 %v388_v42, %v364_v29 }
  0x45   :  { %339 = vmax.xlane.f32.xlu1 %v131_v58 }
  0x46   :  { %323 = vmax.xlane.f32.xlu0 %v123_v59  ;;  %v926_v59 = vsub.s32 %v395_v43, %v364_v29 }
  0x49   :  { %341 = vmax.xlane.f32.xlu1 %v132_v60 }
  0x4a   :  { %325 = vmax.xlane.f32.xlu0 %v124_v61 }
  0x4d   :  { %343 = vmax.xlane.f32.xlu1 %v133_v62 }
  0x4e   :  { %327 = vmax.xlane.f32.xlu0 %v125_v63  ;;  %v930_v63 = vsub.s32 %v402_v47, %v364_v29 }
  0x9a   :  { %v266_v9 = vpop.xlane.xlu1 %265 }
  0x9b   :  { %v250_v10 = vpop.xlane.xlu0 %249  ;;  %v289_v44 = vmul.f32 0.00390625, %v266_v9 }
  0x9c   :  { %v281_v48 = vmul.f32 0.00390625, %v250_v10 }
  0x9d   :  { %v419_v60 = vrot.slane %v289_v44, %v910_v35 }
  0x9e   :  { %v268_v11 = vpop.xlane.xlu1 %267  ;;  %v366_v0 = vrot.slane %v281_v48, %v910_v35 }
  0x9f   :  { %v252_v12 = vpop.xlane.xlu0 %251  ;;  %v290_v38 = vmul.f32 0.00390625, %v268_v11 }
  0xa0   :  { %v282_v41 = vmul.f32 0.00390625, %v252_v12 }
  0xa1   :  { %v423_v53 = vrot.slane %v290_v38, %v912_v37 }
  0xa2   :  { %v270_v13 = vpop.xlane.xlu1 %269  ;;  %v371_v56 = vrot.slane %v282_v41, %v912_v37 }
  0xa3   :  { %v254_v14 = vpop.xlane.xlu0 %253  ;;  %v291_v45 = vmul.f32 0.00390625, %v270_v13  ;;  %v424_v5 = vsel %vm372_vm1, %v423_v53, %v419_v60 }
  0xa4   :  { %v283_v49 = vmul.f32 0.00390625, %v254_v14  ;;  %v373_v10 = vsel %vm372_vm1, %v371_v56, %v366_v0 }
  0xa5   :  { %v428_v61 = vrot.slane %v291_v45, %v914_v39 }
  0xa6   :  { %v272_v15 = vpop.xlane.xlu1 %271  ;;  %v378_v1 = vrot.slane %v283_v49, %v914_v39 }
  0xa7   :  { %v256_v16 = vpop.xlane.xlu0 %255  ;;  %v292_v50 = vmul.f32 0.00390625, %v272_v15  ;;  %v429_v14 = vsel %vm379_vm2, %v428_v61, %v424_v5 }
  0xa8   :  { %v284_v54 = vmul.f32 0.00390625, %v256_v16 }
  0xa9   :  { %v433_v2 = vrot.slane %v292_v50, %v916_v46 }
  0xaa   :  { %v894_v17 = vpop.xlane.xlu1 %315  ;;  %v385_v6 = vrot.slane %v284_v54, %v916_v46 }
  0xab   :  { %v896_v18 = vpop.xlane.xlu0 %313  ;;  %v481_v7 = vrot.slane %v894_v17, %v912_v37 }
  0xac   :  { %v477_v8 = vrot.slane %v896_v18, %v910_v35  ;;  %v380_v18 = vsel %vm379_vm2, %v378_v1, %v373_v10 }
  0xae   :  { %v898_v19 = vpop.xlane.xlu1 %331 }
  0xaf   :  { %v900_v20 = vpop.xlane.xlu0 %329  ;;  %v520_v11 = vrot.slane %v898_v19, %v912_v37  ;;  %v387_v19 = vsel %vm386_vm3, %v385_v6, %v380_v18 }
  0xb0   :  { %v516_v12 = vrot.slane %v900_v20, %v910_v35  ;;  %v482_v20 = vsel %vm372_vm1, %v481_v7, %v477_v8 }
  0xb2   :  { %v274_v21 = vpop.xlane.xlu1 %273  ;;  %v521_v34 = vsel %vm372_vm1, %v520_v11, %v516_v12  ;;  %v640_v11 = vld [vmem:[%s1010_s2] sm:$0xf]  ;;  %s817_s2 = scalar_lea.vmem %s738_s9, 32 }
  0xb3   :  { %v258_v22 = vpop.xlane.xlu0 %257  ;;  %v293_v58 = vmul.f32 0.00390625, %v274_v21  ;;  %v434_v21 = vsel %vm386_vm3, %v433_v2, %v429_v14  ;;  %783 = vmatpush3.msk.msra.mxu1 %vm645_vm12, %v640_v11  ;;  %p818_p5 = scmp.ne.s32.totalorder %s738_s9, %s817_s2  ;;  %p823_p7 = scmp.lt.s32.totalorder %s817_s2, %s817_s2 }
  0xb4   :  { %v285_v62 = vmul.f32 0.00390625, %v258_v22 }
  0xb5   :  { %v438_v13 = vrot.slane %v293_v58, %v924_v57  ;;  %p824_p8 = por %p823_p7, %p822_p6 }
  0xb6   :  { %v902_v23 = vpop.xlane.xlu1 %333  ;;  %v392_v15 = vrot.slane %v285_v62, %v924_v57 }
  0xb7   :  { %v904_v24 = vpop.xlane.xlu0 %317  ;;  %v525_v29 = vrot.slane %v902_v23, %v914_v39  ;;  %p825_p9 = pnand %p824_p8, %p818_p5 }
  0xb9   :  { %v526_v43 = vsel %vm379_vm2, %v525_v29, %v521_v34 }
  0xba   :  { %v276_v26 = vpop.xlane.xlu1 %275 }
  0xbb   :  { %v260_v27 = vpop.xlane.xlu0 %259  ;;  %v294_v16 = vmul.f32 0.00390625, %v276_v26  ;;  %v439_v26 = vsel %vm393_vm4, %v438_v13, %v434_v21 }
  0xbc   :  { %v286_v17 = vmul.f32 0.00390625, %v260_v27  ;;  %v486_v27 = vrot.slane %v904_v24, %v914_v39 }
  0xbd   :  { %v443_v37 = vrot.slane %v294_v16, %v926_v59 }
  0xbe   :  { %v906_v30 = vpop.xlane.xlu1 %335  ;;  %v399_v38 = vrot.slane %v286_v17, %v926_v59 }
  0xbf   :  { %v908_v33 = vpop.xlane.xlu0 %319  ;;  %v530_v23 = vrot.slane %v906_v30, %v916_v46  ;;  %v444_v50 = vsel %vm400_vm5, %v443_v37, %v439_v26 }
  0xc1   :  { %v531_v52 = vsel %vm386_vm3, %v530_v23, %v526_v43 }
  0xc2   :  { %v278_v36 = vpop.xlane.xlu1 %277 }
  0xc3   :  { %v262_v40 = vpop.xlane.xlu0 %261  ;;  %v295_v22 = vmul.f32 0.00390625, %v278_v36  ;;  %v394_v36 = vsel %vm393_vm4, %v392_v15, %v387_v19 }
  0xc4   :  { %v287_v25 = vmul.f32 0.00390625, %v262_v40  ;;  %v491_v40 = vrot.slane %v908_v33, %v916_v46  ;;  %v487_v33 = vsel %vm379_vm2, %v486_v27, %v482_v20 }
  0xc5   :  { %v448_v41 = vrot.slane %v295_v22, %v930_v63 }
  0xc6   :  { %v918_v51 = vpop.xlane.xlu1 %337  ;;  %v406_v42 = vrot.slane %v287_v25, %v930_v63  ;;  %v492_v54 = vsel %vm386_vm3, %v491_v40, %v487_v33 }
  0xc7   :  { %v921_v55 = vpop.xlane.xlu0 %321  ;;  %v535_v24 = vrot.slane %v918_v51, %v924_v57  ;;  %v401_v51 = vsel %vm400_vm5, %v399_v38, %v394_v36 }
  0xc8   :  { %v496_v44 = vrot.slane %v921_v55, %v924_v57  ;;  %v449_v55 = vsel %vm407_vm6, %v448_v41, %v444_v50  ;;  %v408_v56 = vsel %vm407_vm6, %v406_v42, %v401_v51 }
  0xc9   :  { %v536_v57 = vsel %vm393_vm4, %v535_v24, %v531_v52 }
  0xca   :  { %v280_v4 = vpop.xlane.xlu1 %279 }
  0xcb   :  { %v264_v9 = vpop.xlane.xlu0 %263  ;;  %v296_v31 = vmul.f32 0.00390625, %v280_v4 }
  0xcc   :  { %v288_v35 = vmul.f32 0.00390625, %v264_v9 }
  0xcd   :  { %v453_v45 = vrot.slane %v296_v31, %v935_v3 }
  0xce   :  { %v340_v28 = vpop.xlane.xlu1 %339  ;;  %v413_v46 = vrot.slane %v288_v35, %v935_v3 }
  0xcf   :  { %v324_v32 = vpop.xlane.xlu0 %323  ;;  %v540_v30 = vrot.slane %v340_v28, %v926_v59  ;;  %v454_v60 = vsel %vm414_vm7, %v453_v45, %v449_v55 }
  0xd0   :  { %v501_v48 = vrot.slane %v324_v32, %v926_v59  ;;  %v497_v59 = vsel %vm393_vm4, %v496_v44, %v492_v54 }
  0xd1   :  { %v541_v61 = vsel %vm400_vm5, %v540_v30, %v536_v57 }
  0xd2   :  { %v342_v39 = vpop.xlane.xlu1 %341  ;;  %v502_v1 = vsel %vm400_vm5, %v501_v48, %v497_v59 }
  0xd3   :  { %v326_v47 = vpop.xlane.xlu0 %325  ;;  %v545_v49 = vrot.slane %v342_v39, %v930_v63 }
  0xd4   :  { %v506_v53 = vrot.slane %v326_v47, %v930_v63  ;;  %v415_v63 = vsel %vm414_vm7, %v413_v46, %v408_v56 }
  0xd5   :  { %v546_v2 = vsel %vm407_vm6, %v545_v49, %v541_v61  ;;  %v456_v8 = vsel %vm455_vm8, %v454_v60, %v415_v63 }
  0xd6   :  { %v344_v58 = vpop.xlane.xlu1 %343  ;;  %v507_v5 = vsel %vm407_vm6, %v506_v53, %v502_v1 }
  0xd7   :  { %v550_v62 = vrot.slane %v344_v58, %v935_v3  ;;  %v328_v0 = vpop.xlane.xlu0 %327 }
  0xd8   :  { %v511_v4 = vrot.slane %v328_v0, %v935_v3 }
  0xd9   :  { %v551_v6 = vsel %vm414_vm7, %v550_v62, %v546_v2 }
  0xda   :  { %v512_v7 = vsel %vm414_vm7, %v511_v4, %v507_v5 }
  0xdb   :  { %v553_v9 = vsel %vm552_vm9, %v551_v6, %v512_v7 }
  0xdc   :  { %v556_v10 = vsel %vm555_vm10, %v456_v8, %v553_v9 }
  0xdd   :  { %780 = vmatmul.mubr.msk.f32.vlgmr.msra.gmra.mxu0 %vm565_vm11, %v556_v10 }
 0x19d   :  { %v635_v3 = vpop.f32.mrf.mxu0 }
 0x19e   :  { %v639_v12 = vmax.f32 %v635_v3, 0.0 }
 0x19f   :  { %v781_v13 = vpop.f32.mrf.mxu0 }
 0x1a0   :  { %785 = vmatmul.mubr.msk.f32.vlgmr.msra.gmra.mxu1 %vm641_vm13, %v639_v12 }
 0x260   :  { %v715_v14 = vpop.f32.mrf.mxu1 }
 0x261   :  { %v720_v15 = vrot.slane %v715_v14, 2 }
 0x262   :  { %v786_v16 = vpop.f32.mrf.mxu1 }
 0x263   :  { %v722_v17 = vadd.f32 %v720_v15, %v715_v14 }
 0x265   :  { %v751_v18 = vmul.f32 -1.442695, %v722_v17 }
 0x267   :  { %793 = vpow2.f32 %v751_v18 }
 0x274   :  { %v794_v21 = vpop.eup %793 }
 0x275   :  { %v726_v22 = vadd.f32 1.0, %v794_v21 }
 0x277   :  { %795 = vrcp.f32 %v726_v22 }
 0x284   :  { %v796_v25 = vpop.eup %795 }
 0x285   :  { %730 = vst.msk [vmem:[#allocation7] sm:$0x3] %vm729_vm14, %v796_v25 }
 0x286   :  { %828 = shalt.err (!%p825_p9)
}
 0x287   :  { %740 = dma.vmem_to_hbm [thread:$0]  %s738_s9, 32, %s1011_s3, [#allocation6]  }
 0x288   :  { %839 = dma.done.wait [#allocation6], 32  }
 0x289   :  { %840 = vsyncadd [#allocation6], 4294967264 }
 0x28a   :  { %744 = vsyncpa [#allocation5], 1 }
 0x28b   :  { %745 = vsyncpa [#allocation6], 1 }

</bundles_post_ra>
